<compile_context>
chip_gen: v7x
topology: tpu7x:2x2x1
jax: 0.10.0
libtpu: 0.0.40
codegen_flags: <defaults>
</compile_context>

<pallas_src>
import functools

import jax
import jax.numpy as jnp
from jax.experimental import pallas as pl
from jax.experimental.pallas import tpu as pltpu

LANE = 128                      # pad all matmul K/N dims to 128-lane multiples
_PAD = 8                        # sublane-aligned sequence halo (>= conv reach 2)
_TAP_OFFSETS = (-2, -1, 0, 1, 2)


def _round_up(x, m):
    return ((x + m - 1) // m) * m


def _pick_batch_tile(batch):
    """Largest tile <= 8 that still leaves >= 2 batch grid blocks (v7x: 2 TCs)."""
    if batch <= 2:
        return 1
    for tb in range(min(8, batch // 2), 0, -1):
        if batch % tb == 0:
            return tb
    return 1


@functools.lru_cache(maxsize=None)
def _roll_shift_sign():
    """pltpu.roll is documented to match jnp.roll (out[i] = x[i - shift]); probe
    once on-device so the tap-shift sign is robust across Mosaic versions."""
    def k(x_ref, o_ref):
        o_ref[...] = pltpu.roll(x_ref[...], shift=1, axis=0)

    x = jnp.broadcast_to(jnp.arange(8, dtype=jnp.float32)[:, None], (8, 128))
    y = pl.pallas_call(k, out_shape=jax.ShapeDtypeStruct((8, 128), jnp.float32))(x)
    # jnp.roll semantics => y[1] == x[0] == 0 => to read x[g+off] use shift=-off.
    return -1 if float(y[1, 0]) == 0.0 else 1


# ---------------------------------------------------------------------------
# Fused Pallas kernel: stem conv + depth x CNN_Block + max pool
# ---------------------------------------------------------------------------

def _cnn_text_fused_kernel(x_ref, sw_ref, sb_ref,
                           wt_ref, bt_ref, wh_ref, bh_ref, wo_ref, bo_ref,
                           o_ref, hp_ref, *,
                           seq_len, seq_pitch, batch_tile, roll_sign):
    """Grid = (B // TB, depth); depth is the inner ('arbitrary') axis.

    x_ref : (TB*S, Cin)        bf16  zero-haloed input rows of this batch tile
    sw_ref: (Cin, C)           bf16  stem Conv1d(k=1) weight   sb_ref: (1, C) f32
    wt_ref: (depth*5, C, 3nf)  bf16  per-offset concat conv weights (ALL depths, VMEM-resident)
    bt_ref: (depth, 1, 3nf)    f32
    wh_ref: (depth, 3nf, H)    bf16  FFNN hidden weights        bh_ref: (depth, 1, H) f32
    wo_ref: (depth, H, C)      bf16  FFNN output weights        bo_ref: (depth, 1, C) f32
    o_ref : (1, TB, C)         f32   per-sequence max-pooled output (written at last depth)
    hp_ref: (TB*S, C)          f32   persistent zero-haloed activation scratch
    """
    d = pl.program_id(1)
    L, S, TB, P = seq_len, seq_pitch, batch_tile, _PAD
    R = TB * S

    # Mask of the L "real" rows inside each sequence's S-row slot (halos -> 0).
    row = jax.lax.broadcasted_iota(jnp.int32, (R, 1), 0)
    rin = row % S
    center = jnp.logical_and(rin >= P, rin < P + L)

    # ---- Stem: Conv1d(input_dim, hidden_dim, kernel=1) == per-position matmul.
    #      Single masked full-buffer store (no separate zeroing pass).
    @pl.when(d == 0)
    def _():
        stem = (jnp.dot(x_ref[...], sw_ref[...],
                        preferred_element_type=jnp.float32) + sb_ref[...])
        hp_ref[...] = jnp.where(center, stem, 0.0)      # halo rows stay exactly 0

    # ---- The three 'same' Conv1d (k=1,3,5) folded into 5 per-offset matmuls that
    #      directly produce the concatenated [c1|c3|c5] feature.  The activation is
    #      cast to bf16 once; tap shifts are applied to the f32 matmul outputs via
    #      pltpu.roll (XLU).  Halo rows are zero, so any tap reaching into a halo
    #      (incl. cross-sequence / roll wrap-around rows) contributes exactly 0.
    xb = hp_ref[...].astype(jnp.bfloat16)                # (R, C), cast hoisted
    acc = bt_ref[d]                                      # (1, 3nf) f32, broadcasts
    for t, off in enumerate(_TAP_OFFSETS):
        y = jnp.dot(xb, wt_ref[d * 5 + t], preferred_element_type=jnp.float32)
        if off != 0:
            y = pltpu.roll(y, shift=(roll_sign * off) % R, axis=0)  # y'[g] = y[g+off]
        acc = acc + y
    feats = jnp.maximum(acc, 0.0).astype(jnp.bfloat16)   # ReLU(conv outputs), (R, 3nf)

    # ---- FFNN: Linear -> ReLU -> Linear (bf16 matmuls, f32 accumulation).
    hid = jnp.maximum(
        jnp.dot(feats, wh_ref[d], preferred_element_type=jnp.float32)
        + bh_ref[d], 0.0).astype(jnp.bfloat16)
    out = (jnp.dot(hid, wo_ref[d], preferred_element_type=jnp.float32)
           + bo_ref[d])                                  # (R, C) f32

    # ---- Residual connection; halo rows are forced back to 0 every depth step.
    new_h = hp_ref[...] + jnp.where(center, out, 0.0)
    hp_ref[...] = new_h

    # ---- torch.max(output, dim=-1)[0]: max over each sequence's L real rows.
    @pl.when(d == pl.num_programs(1) - 1)
    def _():
        pooled = [jnp.max(new_h[t * S + P:t * S + P + L, :], axis=0, keepdims=True)
                  for t in range(TB)]
        o_ref[0] = pooled[0] if TB == 1 else jnp.concatenate(pooled, axis=0)


# ---------------------------------------------------------------------------
# Wrapper
# ---------------------------------------------------------------------------

def cnn_text_forward(x, attention_mask, packed, *, batch_tile=None):
    """x: (B, seq_len, input_dim) f32 — PyTorch's `x` before its .transpose(1, 2)."""
    del attention_mask                                  # unused for pooling_type='max'
    B, L, cin = x.shape
    cin_p, C = packed["sw"].shape
    N3 = packed["wt"].shape[-1]
    H = packed["wh"].shape[-1]
    depth = packed["wh"].shape[0]
    hidden = packed["hidden_dim"]

    TB = _pick_batch_tile(B) if batch_tile is None else batch_tile
    assert B % TB == 0, (B, TB)
    P = _PAD
    S = _round_up(L + 2 * P, 8)          # per-sequence row pitch (sublane aligned)
    R = TB * S

    # Zero-haloed, channel-padded, bf16 input laid out flat so one batch tile is
    # a single sublane-aligned (TB*S, cin_p) block.
    xp = jnp.zeros((B, S, cin_p), jnp.bfloat16)
    xp = xp.at[:, P:P + L, :cin].set(x.astype(jnp.bfloat16))
    xp = xp.reshape(B * S, cin_p)

    w_bytes = (2 * (packed["sw"].size + packed["wt"].size
                    + packed["wh"].size + packed["wo"].size)
               + 4 * (packed["sb"].size + packed["bt"].size
                      + packed["bh"].size + packed["bo"].size))
    flops = (B // TB) * 2 * R * (cin_p * C
                                 + depth * (5 * C * N3 + N3 * H + H * C))
    bytes_acc = xp.size * 2 + w_bytes + B * C * 4        # weights loaded once/call

    # Resident-weight VMEM budget: weights (x2 in case the pipeline keeps double
    # buffers) + x tile (x2) + out tile (x2) + f32 scratch + headroom for the
    # f32 intermediates.  At production sizes this is ~50 MB: fine on v5e/v6e
    # (128 MiB) and within v7x's 64 MiB.
    # TODO(synk): on v7x, if a larger config pushes this past ~56 MiB, fall back
    #             to per-depth weight streaming (index_map (d, 0, 0)).
    vmem_bytes = (2 * (w_bytes + R * cin_p * 2 + TB * C * 4)
                  + R * C * 4 + (8 << 20))
    vmem_limit = int(min(100 << 20, max(32 << 20, vmem_bytes)))

    roll_sign = _roll_shift_sign()

    out = pl.pallas_call(
        functools.partial(_cnn_text_fused_kernel, seq_len=L, seq_pitch=S,
                          batch_tile=TB, roll_sign=roll_sign),
        out_shape=jax.ShapeDtypeStruct((B // TB, TB, C), jnp.float32),
        grid=(B // TB, depth),
        in_specs=[
            pl.BlockSpec((R, cin_p), lambda b, d: (b, 0)),              # x rows (per batch tile)
            pl.BlockSpec((cin_p, C), lambda b, d: (0, 0)),              # stem weight
            pl.BlockSpec((1, C), lambda b, d: (0, 0)),                  # stem bias
            pl.BlockSpec((depth * 5, C, N3), lambda b, d: (0, 0, 0)),   # conv taps (ALL depths, resident)
            pl.BlockSpec((depth, 1, N3), lambda b, d: (0, 0, 0)),       # conv biases
            pl.BlockSpec((depth, N3, H), lambda b, d: (0, 0, 0)),       # ffnn W1
            pl.BlockSpec((depth, 1, H), lambda b, d: (0, 0, 0)),        # ffnn b1
            pl.BlockSpec((depth, H, C), lambda b, d: (0, 0, 0)),        # ffnn W2
            pl.BlockSpec((depth, 1, C), lambda b, d: (0, 0, 0)),        # ffnn b2
        ],
        out_specs=pl.BlockSpec((1, TB, C), lambda b, d: (b, 0, 0)),
        scratch_shapes=[pltpu.VMEM((R, C), jnp.float32)],
        compiler_params=pltpu.CompilerParams(
            dimension_semantics=("parallel", "arbitrary"),
            vmem_limit_bytes=vmem_limit),
        cost_estimate=pl.CostEstimate(flops=flops, transcendentals=0,
                                      bytes_accessed=bytes_acc),
    )(xp, packed["sw"], packed["sb"], packed["wt"], packed["bt"],
      packed["wh"], packed["bh"], packed["wo"], packed["bo"])

    return out.reshape(B, C)[:, :hidden]                 # (B, hidden_dim)


# ---------------------------------------------------------------------------
# Parameters: raw (PyTorch-shaped, channels-last) + lane-padded packed form
# ---------------------------------------------------------------------------

def _n(key, shape):
    return 0.1 * jax.random.normal(key, shape, jnp.float32)


def init_params(key, input_dim, hidden_dim, n_filters, depth):
    hff = (3 * n_filters + hidden_dim) // 2
    keys = jax.random.split(key, 2 + depth)
    params = {"stem_w": _n(keys[0], (input_dim, hidden_dim)),
              "stem_b": _n(keys[1], (hidden_dim,)),
              "blocks": []}
    for dd in range(depth):
        bk = jax.random.split(keys[2 + dd], 10)
        params["blocks"].append({
            "w1": _n(bk[0], (hidden_dim, n_filters)), "b1": _n(bk[1], (n_filters,)),
            "w3": _n(bk[2], (3, hidden_dim, n_filters)), "b3": _n(bk[3], (n_filters,)),
            "w5": _n(bk[4], (5, hidden_dim, n_filters)), "b5": _n(bk[5], (n_filters,)),
            "wh": _n(bk[6], (3 * n_filters, hff)), "bh": _n(bk[7], (hff,)),
            "wo": _n(bk[8], (hff, hidden_dim)), "bo": _n(bk[9], (hidden_dim,)),
        })
    return params


def pack_params(params, input_dim, hidden_dim, n_filters, depth):
    """Zero-pad to lane multiples, fold the 3 convs into 5 per-offset weights, bf16."""
    nf = n_filters
    n3 = 3 * nf
    hff = (3 * n_filters + hidden_dim) // 2
    cin_p = _round_up(input_dim, LANE)
    C = _round_up(hidden_dim, LANE)
    N3 = _round_up(n3, LANE)
    H = _round_up(hff, LANE)

    def pad_to(a, shape):
        return jnp.zeros(shape, jnp.float32).at[
            tuple(slice(0, s) for s in a.shape)].set(a)

    sw = pad_to(params["stem_w"], (cin_p, C)).astype(jnp.bfloat16)
    sb = pad_to(params["stem_b"][None, :], (1, C))

    wt = jnp.zeros((depth * 5, C, N3), jnp.float32)
    bt = jnp.zeros((depth, 1, N3), jnp.float32)
    wh = jnp.zeros((depth, N3, H), jnp.float32)
    bh = jnp.zeros((depth, 1, H), jnp.float32)
    wo = jnp.zeros((depth, H, C), jnp.float32)
    bo = jnp.zeros((depth, 1, C), jnp.float32)

    for dd, blk in enumerate(params["blocks"]):
        # per-offset concatenated conv weights; feature columns are [c1 | c3 | c5]
        for t, off in enumerate(_TAP_OFFSETS):
            row = dd * 5 + t
            if off == 0:
                wt = wt.at[row, :hidden_dim, 0 * nf:1 * nf].set(blk["w1"])
            if -1 <= off <= 1:
                wt = wt.at[row, :hidden_dim, 1 * nf:2 * nf].set(blk["w3"][off + 1])
            wt = wt.at[row, :hidden_dim, 2 * nf:3 * nf].set(blk["w5"][off + 2])
        bt = bt.at[dd, 0, 0 * nf:1 * nf].set(blk["b1"])
        bt = bt.at[dd, 0, 1 * nf:2 * nf].set(blk["b3"])
        bt = bt.at[dd, 0, 2 * nf:3 * nf].set(blk["b5"])
        wh = wh.at[dd, :n3, :hff].set(blk["wh"])
        bh = bh.at[dd, 0, :hff].set(blk["bh"])
        wo = wo.at[dd, :hff, :hidden_dim].set(blk["wo"])
        bo = bo.at[dd, 0, :hidden_dim].set(blk["bo"])

    return {"sw": sw, "sb": sb,
            "wt": wt.astype(jnp.bfloat16), "bt": bt,
            "wh": wh.astype(jnp.bfloat16), "bh": bh,
            "wo": wo.astype(jnp.bfloat16), "bo": bo,
            "hidden_dim": hidden_dim}


# ---------------------------------------------------------------------------
# Pure-JAX reference (mirrors the kernel's bf16-matmul / f32-accumulate precision)
# ---------------------------------------------------------------------------

def _bdot(a, b):
    return jnp.einsum("...ij,jk->...ik",
                      a.astype(jnp.bfloat16), b.astype(jnp.bfloat16),
                      preferred_element_type=jnp.float32)


def _ref_block(h, p):
    B, L, C = h.shape
    hp = jnp.pad(h, ((0, 0), (2, 2), (0, 0)))
    c1 = _bdot(h, p["w1"]) + p["b1"]
    c3 = sum(_bdot(hp[:, 1 + k:1 + k + L], p["w3"][k]) for k in range(3)) + p["b3"]
    c5 = sum(_bdot(hp[:, k:k + L], p["w5"][k]) for k in range(5)) + p["b5"]
    feats = jnp.concatenate(
        [jax.nn.relu(c1), jax.nn.relu(c3), jax.nn.relu(c5)], axis=-1)
    hid = jax.nn.relu(_bdot(feats, p["wh"]) + p["bh"])
    return h + _bdot(hid, p["wo"]) + p["bo"]


def ref_forward(x, params):
    h = _bdot(x, params["stem_w"]) + params["stem_b"]
    for blk in params["blocks"]:
        h = _ref_block(h, blk)
    return jnp.max(h, axis=1)


# ---------------------------------------------------------------------------
# Main
# ---------------------------------------------------------------------------

if __name__ == "__main__":
    B, SEQ, INPUT_DIM = 4, 8, 32          # small stand-ins for (batch, seq, 768)
    HIDDEN, N_FILTERS, DEPTH = 16, 8, 2   # stand-ins for 256 / 100 / 12

    key = jax.random.PRNGKey(0)
    kx, kp = jax.random.split(key)
    x = jax.random.normal(kx, (B, SEQ, INPUT_DIM), jnp.float32)
    attention_mask = jnp.ones((B, SEQ), jnp.float32)   # unused for 'max' pooling

    raw_params = init_params(kp, INPUT_DIM, HIDDEN, N_FILTERS, DEPTH)
    packed = pack_params(raw_params, INPUT_DIM, HIDDEN, N_FILTERS, DEPTH)

    out = cnn_text_forward(x, attention_mask, packed)   # exercises batch_tile = 2
    out = jax.block_until_ready(out)

    ref = ref_forward(x, raw_params)
    assert out.shape == (B, HIDDEN), out.shape
    max_err = float(jnp.max(jnp.abs(out - ref)))
    assert jnp.allclose(out, ref, atol=2e-3, rtol=2e-3), max_err

    print("KERNEL_OK")
</pallas_src>

<mosaic_0001>
module attributes {stable_mosaic.version = 11 : i64} {
  func.func @k(%arg0: memref<8x128xf32, #tpu.memory_space<vmem>>, %arg1: memref<8x128xf32, #tpu.memory_space<vmem>>) attributes {dimension_semantics = [], scalar_prefetch = 0 : i64, scratch_operands = 0 : i64, tpu.core_type = #tpu.core_type<tc>} {
    %c0 = arith.constant 0 : index
    %c0_0 = arith.constant 0 : index
    %0 = vector.load %arg0[%c0, %c0_0] : memref<8x128xf32, #tpu.memory_space<vmem>>, vector<8x128xf32>
    %c1_i32 = arith.constant 1 : i32
    %1 = tpu.dynamic_rotate %0 by %c1_i32 dim 0 : vector<8x128xf32>, i32 -> vector<8x128xf32>
    %c0_1 = arith.constant 0 : index
    %c0_2 = arith.constant 0 : index
    %2 = vector.load %arg1[%c0_1, %c0_2] : memref<8x128xf32, #tpu.memory_space<vmem>>, vector<8x128xf32>
    tpu.vector_store %arg1[%c0_1, %c0_2], %1 {strides = array<i32>} : memref<8x128xf32, #tpu.memory_space<vmem>>, vector<8x128xf32>,
    return
  }
}

</mosaic_0001>

<bundles_post_ra>
// kernel: tpu_custom_call.1
= control target key start
LH: loop header
LB: loop body
LE: loop exit
PB: predicated region body
PF: predicated region fallthrough
CT: control target
= control target key end

     0   :  { %6 = vsyncpa [#allocation3], 0  ;;  %s125_s0 = inlined_call_operand.hbm [shape: f32[8,128], index: 0, kind: input, shape index: {}]   ;;  %s126_s1 = inlined_call_operand.hbm [shape: f32[8,128], index: 1, kind: output, shape index: {}]  }
   0x1   :  { %7 = vsyncpa [#allocation4], 0  ;;  %s89_s6 = smov [#allocation2]   ;;  %s41_s10 = scalar_lea.hbm %s125_s0, 128 }
   0x2   :  { %s14_s7 = sshll.u32 %s89_s6, 4  ;;  %p42_p0 = scmp.ne.s32.totalorder %s125_s0, %s41_s10  ;;  %s15_s7 = int_to_ptr.vmem [resolvable:$true] %s14_s7 }
   0x3   :  { %p45_p1 = scmp.lt.u32.totalorder %s41_s10, %s125_s0 }
   0x5   :  { %p47_p2 = pnand %p45_p1, %p42_p0 }
   0x7   :  { %50 = shalt.err (!%p47_p2)
}
   0x8   :  { %s51_s15 = scalar_lea.vmem %s15_s7, 128  ;;  %p56_p4 = scmp.lt.s32.totalorder %s15_s7, %s15_s7 }
   0x9   :  { %p52_p3 = scmp.ne.s32.totalorder %s15_s7, %s51_s15  ;;  %p57_p5 = scmp.lt.s32.totalorder %s51_s15, %s51_s15 }
   0xb   :  { %p58_p6 = por %p57_p5, %p56_p4 }
   0xd   :  { %p59_p7 = pnand %p58_p6, %p52_p3 }
   0xf   :  { %62 = shalt.err (!%p59_p7)
}
  0x10   :  { %17 = dma.hbm_to_vmem [thread:$0]  %s125_s0, 128, %s15_s7, [#allocation3]  }
  0x11   :  { %85 = dma.done.wait [#allocation3], 128  }
  0x12   :  { %86 = vsyncadd [#allocation3], 4294967168  ;;  %s90_s18 = smov [#allocation5]   ;;  %v21_v0 = vld [vmem:[#allocation2] sm:$0xff] }
  0x13   :  { %s30_s19 = sshll.u32 %s90_s18, 4  ;;  %v22_v1 = vrot.slane %v21_v0, 7  ;;  %s31_s19 = int_to_ptr.vmem [resolvable:$true] %s30_s19 }
  0x14   :  { %s63_s20 = scalar_lea.vmem %s31_s19, 128  ;;  %p68_p9 = scmp.lt.s32.totalorder %s31_s19, %s31_s19 }
  0x15   :  { %23 = vst [vmem:[#allocation5] sm:$0xff] %v22_v1  ;;  %p64_p8 = scmp.ne.s32.totalorder %s31_s19, %s63_s20  ;;  %p69_p10 = scmp.lt.s32.totalorder %s63_s20, %s63_s20 }
  0x17   :  { %p70_p11 = por %p69_p10, %p68_p9 }
  0x19   :  { %p71_p12 = pnand %p70_p11, %p64_p8 }
  0x1b   :  { %74 = shalt.err (!%p71_p12)
}
  0x1c   :  { %s75_s23 = scalar_lea.hbm %s126_s1, 128 }
  0x1d   :  { %p76_p13 = scmp.ne.s32.totalorder %s126_s1, %s75_s23  ;;  %p79_p0 = scmp.lt.u32.totalorder %s75_s23, %s126_s1 }
  0x1f   :  { %p81_p1 = pnand %p79_p0, %p76_p13 }
  0x21   :  { %84 = shalt.err (!%p81_p1)
}
  0x22   :  { %33 = dma.vmem_to_hbm [thread:$0]  %s31_s19, 128, %s126_s1, [#allocation4]  }
  0x23   :  { %87 = dma.done.wait [#allocation4], 128  }
  0x24   :  { %88 = vsyncadd [#allocation4], 4294967168 }
  0x25   :  { %37 = vsyncpa [#allocation3], 1 }
  0x26   :  { %38 = vsyncpa [#allocation4], 1 }

</bundles_post_ra>
